<compile_context>
chip_gen: v7x
topology: tpu7x:2x2x1
jax: 0.10.0
libtpu: 0.0.40
codegen_flags: <defaults>
</compile_context>

<pallas_src>
import jax
import jax.numpy as jnp
from jax.experimental import pallas as pl
from jax.experimental.pallas import tpu as pltpu


_LANES = 128          # vreg lane width; keep the last dim a multiple of this.
_MAX_TILE_ROWS = 512  # 512 x 128 f32 = 256 KiB/tile; (2 in + 2 out) buffers
                      # ~= 1 MiB VMEM -> safe on v5e/v6e/v7x scoped defaults.


# ----------------------------------------------------------------------------
# Pallas kernel: identity forward (o = x), one lane-dense tile per grid step.
# ----------------------------------------------------------------------------
def _copy_kernel(x_ref, o_ref):
    o_ref[...] = x_ref[...]


def _pallas_identity_2d(x2d, tile_rows):
    rows, lanes = x2d.shape
    bytes_moved = 2 * rows * lanes * x2d.dtype.itemsize
    return pl.pallas_call(
        _copy_kernel,
        out_shape=jax.ShapeDtypeStruct(x2d.shape, x2d.dtype),
        grid=(rows // tile_rows,),
        in_specs=[pl.BlockSpec((tile_rows, lanes), lambda i: (i, 0))],
        out_specs=pl.BlockSpec((tile_rows, lanes), lambda i: (i, 0)),
        input_output_aliases={0: 0},
        compiler_params=pltpu.CompilerParams(
            dimension_semantics=("parallel",)),
        cost_estimate=pl.CostEstimate(
            flops=0, transcendentals=0, bytes_accessed=bytes_moved),
    )(x2d)


def fc_autoencoder_forward(x, *, skip_copy=False):
    """Forward pass of FC_Autoencoder: returns x unchanged (identity).

    skip_copy=True returns x directly (0 bytes moved) -- the true optimum for
    an identity forward.  The default path runs the tiled Pallas copy kernel.
    """
    if skip_copy:
        return x

    n = x.size
    if n == 0:
        return x

    flat = x.reshape(-1)

    # Lane-dense presentation: (rows, 128), padded so the grid tiles exactly.
    rows = pl.cdiv(n, _LANES)
    tile_rows = _MAX_TILE_ROWS if rows >= _MAX_TILE_ROWS else int(rows)
    rows_padded = pl.cdiv(rows, tile_rows) * tile_rows
    padded_n = rows_padded * _LANES
    if padded_n != n:
        flat = jnp.pad(flat, (0, padded_n - n))
    x2d = flat.reshape(rows_padded, _LANES)

    out2d = _pallas_identity_2d(x2d, tile_rows)
    return out2d.reshape(-1)[:n].reshape(x.shape)


# ----------------------------------------------------------------------------
# Deterministic parameter initialization (mirrors nn.Linear shapes declared in
# the module's __init__).  These parameters are NOT used by forward() -- the
# PyTorch forward is identity -- they exist only for structural fidelity.
# TODO(synk): if forward() ever becomes transmitter->receiver, fuse both
# Linear->ReLU->Linear stacks into a single lane-padded Pallas matmul kernel.
# ----------------------------------------------------------------------------
def init_params(key, k, n_channel):
    d = 2 ** k
    keys = jax.random.split(key, 8)

    def linear(kw, kb, fan_in, fan_out):
        bound = 1.0 / jnp.sqrt(fan_in)
        w = jax.random.uniform(kw, (fan_out, fan_in), jnp.float32, -bound, bound)
        b = jax.random.uniform(kb, (fan_out,), jnp.float32, -bound, bound)
        return w, b

    return {
        # transmitter: Linear(d, d) -> ReLU -> Linear(d, n_channel)
        "tx_w1": linear(keys[0], keys[1], d, d),
        "tx_w2": linear(keys[2], keys[3], d, n_channel),
        # receiver: Linear(n_channel, d) -> ReLU -> Linear(d, d)
        "rx_w1": linear(keys[4], keys[5], n_channel, d),
        "rx_w2": linear(keys[6], keys[7], d, d),
    }


if __name__ == "__main__":
    k = 4          # 2**k = 16 features
    n_channel = 7
    batch = 8

    key = jax.random.PRNGKey(0)
    key_x, key_p = jax.random.split(key)

    # Example input: (batch, 2**k) float32.
    x = jax.random.normal(key_x, (batch, 2 ** k), dtype=jnp.float32)

    # Parameters declared by the module (unused in forward, kept for fidelity).
    _params = init_params(key_p, k, n_channel)

    out = fc_autoencoder_forward(x)
    out = jax.block_until_ready(out)

    # Correctness check against the reference forward (identity).
    assert out.shape == x.shape and out.dtype == x.dtype
    assert bool(jnp.all(out == x))

    # Also check the zero-copy fast path.
    out_fast = jax.block_until_ready(fc_autoencoder_forward(x, skip_copy=True))
    assert bool(jnp.all(out_fast == x))

    print("KERNEL_OK")
</pallas_src>

<mosaic_0001>
module attributes {stable_mosaic.version = 11 : i64} {
  func.func @_copy_kernel(%arg0: i32, %arg1: memref<1x128xf32, #tpu.memory_space<vmem>>, %arg2: memref<1x128xf32, #tpu.memory_space<vmem>>) attributes {dimension_semantics = [#tpu.dimension_semantics<parallel>], iteration_bounds = array<i64: 1>, scalar_prefetch = 0 : i64, scratch_operands = 0 : i64, tpu.core_type = #tpu.core_type<tc>, window_params = [{transform_indices = @transform_0, window_bounds = array<i64: 1, 128>}, {transform_indices = @transform_1, window_bounds = array<i64: 1, 128>}]} {
    %c0 = arith.constant 0 : index
    %c0_0 = arith.constant 0 : index
    %0 = vector.load %arg1[%c0, %c0_0] : memref<1x128xf32, #tpu.memory_space<vmem>>, vector<1x128xf32>
    %c0_1 = arith.constant 0 : index
    %c0_2 = arith.constant 0 : index
    %1 = vector.load %arg2[%c0_1, %c0_2] : memref<1x128xf32, #tpu.memory_space<vmem>>, vector<1x128xf32>
    tpu.vector_store %arg2[%c0_1, %c0_2], %0 {strides = array<i32>} : memref<1x128xf32, #tpu.memory_space<vmem>>, vector<1x128xf32>,
    return
  }
  func.func @transform_0(%arg0: i32) -> (i32, i32) {
    %c0_i32 = arith.constant 0 : i32
    %c0_i32_0 = arith.constant 0 : i32
    return %arg0, %c0_i32 : i32, i32
  }
  func.func @transform_1(%arg0: i32) -> (i32, i32) {
    %c0_i32 = arith.constant 0 : i32
    %c0_i32_0 = arith.constant 0 : i32
    return %arg0, %c0_i32 : i32, i32
  }
}

</mosaic_0001>

<bundles_post_ra>
// kernel: tpu_custom_call.1
= control target key start
LH: loop header
LB: loop body
LE: loop exit
PB: predicated region body
PF: predicated region fallthrough
CT: control target
= control target key end

     0   :  { %6 = vsyncpa [#allocation3], 0  ;;  %s124_s0 = inlined_call_operand.hbm [shape: f32[1,128], index: 0, kind: input, shape index: {}, may-alias: {0,1}]   ;;  %s125_s1 = inlined_call_operand.hbm [shape: f32[1,128], index: 1, kind: output, shape index: {}, may-alias: {0,1}]  }
   0x1   :  { %7 = vsyncpa [#allocation4], 0  ;;  %s88_s6 = smov [#allocation2]   ;;  %s40_s10 = scalar_lea.hbm %s124_s0, 16 }
   0x2   :  { %s14_s7 = sshll.u32 %s88_s6, 4  ;;  %p41_p0 = scmp.ne.s32.totalorder %s124_s0, %s40_s10  ;;  %s15_s7 = int_to_ptr.vmem [resolvable:$true] %s14_s7 }
   0x3   :  { %p44_p1 = scmp.lt.u32.totalorder %s40_s10, %s124_s0 }
   0x5   :  { %p46_p2 = pnand %p44_p1, %p41_p0 }
   0x7   :  { %49 = shalt.err (!%p46_p2)
}
   0x8   :  { %s50_s15 = scalar_lea.vmem %s15_s7, 16  ;;  %s54_s16 = scalar_lea.vmem %s15_s7, 32 }
   0x9   :  { %p51_p3 = scmp.ne.s32.totalorder %s15_s7, %s50_s15  ;;  %p55_p4 = scmp.lt.s32.totalorder %s15_s7, %s15_s7 }
   0xa   :  { %p56_p5 = scmp.lt.s32.totalorder %s54_s16, %s50_s15 }
   0xc   :  { %p57_p6 = por %p56_p5, %p55_p4 }
   0xe   :  { %p58_p7 = pnand %p57_p6, %p51_p3 }
  0x10   :  { %61 = shalt.err (!%p58_p7)
}
  0x11   :  { %17 = dma.hbm_to_vmem [thread:$0]  %s124_s0, 16, %s15_s7, [#allocation3]  }
  0x12   :  { %84 = dma.done.wait [#allocation3], 16  }
  0x13   :  { %85 = vsyncadd [#allocation3], 4294967280  ;;  %s89_s19 = smov [#allocation5]   ;;  %v21_v0 = vld [vmem:[#allocation2] sm:$0x1] }
  0x14   :  { %s29_s20 = sshll.u32 %s89_s19, 4  ;;  %22 = vst [vmem:[#allocation5] sm:$0x1] %v21_v0  ;;  %s30_s20 = int_to_ptr.vmem [resolvable:$true] %s29_s20 }
  0x15   :  { %s62_s21 = scalar_lea.vmem %s30_s20, 16  ;;  %s66_s22 = scalar_lea.vmem %s30_s20, 32 }
  0x16   :  { %p63_p8 = scmp.ne.s32.totalorder %s30_s20, %s62_s21  ;;  %p67_p9 = scmp.lt.s32.totalorder %s30_s20, %s30_s20 }
  0x17   :  { %p68_p10 = scmp.lt.s32.totalorder %s66_s22, %s62_s21 }
  0x19   :  { %p69_p11 = por %p68_p10, %p67_p9 }
  0x1b   :  { %p70_p12 = pnand %p69_p11, %p63_p8 }
  0x1d   :  { %73 = shalt.err (!%p70_p12)
}
  0x1e   :  { %s74_s25 = scalar_lea.hbm %s125_s1, 16 }
  0x1f   :  { %p75_p13 = scmp.ne.s32.totalorder %s125_s1, %s74_s25  ;;  %p78_p0 = scmp.lt.u32.totalorder %s74_s25, %s125_s1 }
  0x21   :  { %p80_p1 = pnand %p78_p0, %p75_p13 }
  0x23   :  { %83 = shalt.err (!%p80_p1)
}
  0x24   :  { %32 = dma.vmem_to_hbm [thread:$0]  %s30_s20, 16, %s125_s1, [#allocation4]  }
  0x25   :  { %86 = dma.done.wait [#allocation4], 16  }
  0x26   :  { %87 = vsyncadd [#allocation4], 4294967280 }
  0x27   :  { %36 = vsyncpa [#allocation3], 1 }
  0x28   :  { %37 = vsyncpa [#allocation4], 1 }

</bundles_post_ra>
